<compile_context>
chip_gen: v7x
topology: tpu7x:2x2x1
jax: 0.10.0
libtpu: 0.0.40
codegen_flags: <defaults>
</compile_context>

<pallas_src>
import functools
from typing import NamedTuple, Tuple

import jax
import jax.numpy as jnp
from jax.experimental import pallas as pl
from jax.experimental.pallas import tpu as pltpu


_VMEM_LIMIT = 64 * 1024 * 1024           # scoped VMEM cap (== v7x physical, < v5e/v6e)
_HIDDEN_VMEM_BUDGET = 32 * 1024 * 1024   # budget for double-buffered hidden tiles / step


def _batch_tile(B: int) -> int:
    # Batch sits on the sublane axis of the mask / output blocks, so the tile
    # must be a multiple of 8 or the full batch.  Out-of-bounds batch rows
    # (when B % 8 != 0) are harmless: their output stores are dropped.
    return B if B < 8 else 8


def _seq_tile(S: int, TB: int, H: int, itemsize: int, n_hidden: int) -> int:
    """Largest multiple-of-128 sequence tile whose double-buffered hidden-state
    footprint stays inside the VMEM budget (or the full S if that fits)."""
    per_pos = 2 * n_hidden * TB * H * itemsize     # 2 = pipeline double buffer
    ts = _HIDDEN_VMEM_BUDGET // max(per_pos, 1)
    ts = max(128, min(2048, (ts // 128) * 128))
    return S if S <= ts else ts


# ---------------------------------------------------------------------------
# Kernels
# ---------------------------------------------------------------------------

def _cls_kernel(h_ref, out_ref):
    # h_ref block: [TB, min(S,8), H] — only a tiny leading slice of the
    # sequence is ever DMA'd; take sequence position 0.
    out_ref[...] = h_ref[:, 0, :].astype(out_ref.dtype)


def _masked_avg_kernel(seq_len, seq_tile, scale, n_hidden, mask_ref, *refs):
    """Generic masked-average kernel over 1 or 2 hidden-state inputs.

    refs = (h_0, ..., h_{n-1}, out_ref, num_acc, den_acc)
    """
    h_refs = refs[:n_hidden]
    out_ref = refs[n_hidden]
    num_acc = refs[n_hidden + 1]
    den_acc = refs[n_hidden + 2]

    s_idx = pl.program_id(1)

    @pl.when(s_idx == 0)
    def _():
        num_acc[...] = jnp.zeros_like(num_acc)
        den_acc[...] = jnp.zeros_like(den_acc)

    # Sum of the hidden inputs for this tile (f32, exact).  [TB, TS, H]
    h = h_refs[0][...].astype(jnp.float32)
    for r in h_refs[1:]:
        h = h + r[...].astype(jnp.float32)

    if seq_len % seq_tile == 0:
        m = mask_ref[...].astype(jnp.float32)                       # [TB, TS]
    else:
        # Ragged tail: the last seq tile runs past S.  Zero the out-of-bounds
        # columns so padding garbage (possibly NaN) never reaches the
        # accumulators of valid batch rows.  Only traced when S % TS != 0.
        pos = jax.lax.broadcasted_iota(jnp.int32, mask_ref.shape, 1)
        valid = pos < (seq_len - s_idx * seq_tile)
        m = jnp.where(valid, mask_ref[...], 0).astype(jnp.float32)
        h = jnp.where(valid[:, :, None], h, 0.0)

    # Masked partial sum over this sequence tile (VPU adds + sublane reduce;
    # the kernel stays HBM-bound).
    num_acc[...] += jnp.sum(h * m[:, :, None], axis=1)              # [TB, H]
    den_acc[...] += jnp.sum(m, axis=1, keepdims=True)               # [TB, 1]

    @pl.when(s_idx == pl.num_programs(1) - 1)
    def _():
        num = num_acc[...]
        if scale != 1.0:
            # /2 of the two-layer averages folded here — one tiny (TB,H) mul
            # instead of a full [TB,TS,H] pass per step.  Exact (power of two).
            num = num * scale
        # NOTE: all-zero mask rows yield inf/nan, matching the PyTorch reference.
        out_ref[...] = (num / den_acc[...]).astype(out_ref.dtype)


# ---------------------------------------------------------------------------
# pallas_call wrappers
# ---------------------------------------------------------------------------

def _cls_pool(last_hidden: jax.Array) -> jax.Array:
    B, S, H = last_hidden.shape
    TB = _batch_tile(B)
    TSEQ = S if S < 8 else 8        # only DMA the leading rows (~S/8 less HBM traffic)
    return pl.pallas_call(
        _cls_kernel,
        out_shape=jax.ShapeDtypeStruct((B, H), last_hidden.dtype),
        grid_spec=pltpu.PrefetchScalarGridSpec(
            num_scalar_prefetch=0,
            grid=(pl.cdiv(B, TB),),
            in_specs=[pl.BlockSpec((TB, TSEQ, H), lambda b: (b, 0, 0))],
            out_specs=pl.BlockSpec((TB, H), lambda b: (b, 0)),
        ),
        compiler_params=pltpu.CompilerParams(
            dimension_semantics=("parallel",),
            vmem_limit_bytes=_VMEM_LIMIT),
    )(last_hidden)


def _masked_avg_pool(attention_mask: jax.Array,
                     hiddens: Tuple[jax.Array, ...],
                     scale: float,
                     *, seq_tile: int = None) -> jax.Array:
    n = len(hiddens)
    B, S, H = hiddens[0].shape
    dtype = hiddens[0].dtype
    TB = _batch_tile(B)
    TS = seq_tile if seq_tile is not None else _seq_tile(
        S, TB, H, jnp.dtype(dtype).itemsize, n)

    kernel = functools.partial(_masked_avg_kernel, S, TS, float(scale), n)
    hidden_spec = pl.BlockSpec((TB, TS, H), lambda b, s: (b, s, 0))

    return pl.pallas_call(
        kernel,
        out_shape=jax.ShapeDtypeStruct((B, H), dtype),
        grid_spec=pltpu.PrefetchScalarGridSpec(
            num_scalar_prefetch=0,
            grid=(pl.cdiv(B, TB), pl.cdiv(S, TS)),      # reduction (seq) axis last
            in_specs=[pl.BlockSpec((TB, TS), lambda b, s: (b, s))]
                     + [hidden_spec] * n,
            out_specs=pl.BlockSpec((TB, H), lambda b, s: (b, 0)),
            scratch_shapes=[pltpu.VMEM((TB, H), jnp.float32),
                            pltpu.VMEM((TB, 1), jnp.float32)]),
        compiler_params=pltpu.CompilerParams(
            dimension_semantics=("parallel", "arbitrary"),
            vmem_limit_bytes=_VMEM_LIMIT),
    )(attention_mask, *hiddens)


# ---------------------------------------------------------------------------
# Module-equivalent wrapper
# ---------------------------------------------------------------------------

class ModelOutputs(NamedTuple):
    last_hidden_state: jax.Array             # [B, S, H]
    pooler_output: jax.Array                  # [B, H]   (unused by these paths)
    hidden_states: Tuple[jax.Array, ...]      # tuple of [B, S, H]


class Pooler:
    """JAX/Pallas equivalent of DpasCSE Pooler.forward (parameter-free)."""

    TYPES = ('cls', 'cls_before_pooler', 'avg', 'avg_top2', 'avg_first_last')

    def __init__(self, pooler_type: str):
        assert pooler_type in self.TYPES, 'unrecognized pooling type %s' % pooler_type
        self.pooler_type = pooler_type

    def __call__(self, attention_mask: jax.Array, outputs: ModelOutputs) -> jax.Array:
        last_hidden = outputs.last_hidden_state
        hidden_states = outputs.hidden_states
        if self.pooler_type in ('cls_before_pooler', 'cls'):
            return _cls_pool(last_hidden)
        elif self.pooler_type == 'avg':
            return _masked_avg_pool(attention_mask, (last_hidden,), 1.0)
        elif self.pooler_type == 'avg_first_last':
            return _masked_avg_pool(attention_mask,
                                    (hidden_states[0], hidden_states[-1]), 0.5)
        elif self.pooler_type == 'avg_top2':
            return _masked_avg_pool(attention_mask,
                                    (hidden_states[-1], hidden_states[-2]), 0.5)
        else:
            raise NotImplementedError


# ---------------------------------------------------------------------------
# Pure-JAX reference (for correctness check)
# ---------------------------------------------------------------------------

def _reference(pooler_type, attention_mask, outputs):
    last_hidden = outputs.last_hidden_state
    hidden_states = outputs.hidden_states
    m = attention_mask.astype(jnp.float32)
    if pooler_type in ('cls_before_pooler', 'cls'):
        return last_hidden[:, 0]
    if pooler_type == 'avg':
        return (last_hidden * m[:, :, None]).sum(1) / m.sum(-1)[:, None]
    if pooler_type == 'avg_first_last':
        h = (hidden_states[0] + hidden_states[-1]) / 2.0
        return (h * m[:, :, None]).sum(1) / m.sum(-1)[:, None]
    if pooler_type == 'avg_top2':
        h = (hidden_states[-1] + hidden_states[-2]) / 2.0
        return (h * m[:, :, None]).sum(1) / m.sum(-1)[:, None]
    raise NotImplementedError


# ---------------------------------------------------------------------------
# Main
# ---------------------------------------------------------------------------

if __name__ == "__main__":
    ok = True

    # --- primary check: all pooling modes at the module's nominal small shapes
    B, S, H = 2, 8, 32
    n_layers = 3  # hidden_states = (embeddings, layer1, ..., layerN)

    key = jax.random.PRNGKey(0)
    keys = jax.random.split(key, n_layers + 3)

    hidden_states = tuple(
        jax.random.normal(keys[i], (B, S, H), dtype=jnp.float32)
        for i in range(n_layers + 1)
    )
    last_hidden = hidden_states[-1]
    pooler_output = jax.random.normal(keys[-2], (B, H), dtype=jnp.float32)

    lengths = jnp.array([8, 5], dtype=jnp.int32)          # 1 = keep
    attention_mask = (jnp.arange(S)[None, :] < lengths[:, None]).astype(jnp.int32)

    outputs = ModelOutputs(last_hidden_state=last_hidden,
                           pooler_output=pooler_output,
                           hidden_states=hidden_states)

    for ptype in Pooler.TYPES:
        got = jax.block_until_ready(Pooler(ptype)(attention_mask, outputs))
        want = _reference(ptype, attention_mask, outputs)
        if got.shape != (B, H):
            ok = False
            print(f"shape mismatch for {ptype}: {got.shape}")
        elif not jnp.allclose(got, want, atol=1e-5, rtol=1e-5):
            ok = False
            print(f"value mismatch for {ptype}")

    # --- secondary check: ragged sequence (S % seq_tile != 0) exercises the
    #     partial-tile masking path of the averaging kernel.
    S2 = 160
    k1, k2 = jax.random.split(jax.random.PRNGKey(1))
    h_a = jax.random.normal(k1, (2, S2, H), dtype=jnp.float32)
    h_b = jax.random.normal(k2, (2, S2, H), dtype=jnp.float32)
    len2 = jnp.array([[150], [97]], dtype=jnp.int32)
    mask2 = (jnp.arange(S2)[None, :] < len2).astype(jnp.int32)
    mf = mask2.astype(jnp.float32)

    got1 = jax.block_until_ready(_masked_avg_pool(mask2, (h_a,), 1.0, seq_tile=128))
    want1 = (h_a * mf[:, :, None]).sum(1) / mf.sum(-1)[:, None]
    if not jnp.allclose(got1, want1, atol=1e-5, rtol=1e-5):
        ok = False
        print("value mismatch for ragged avg")

    got2 = jax.block_until_ready(_masked_avg_pool(mask2, (h_a, h_b), 0.5, seq_tile=128))
    want2 = (((h_a + h_b) / 2.0) * mf[:, :, None]).sum(1) / mf.sum(-1)[:, None]
    if not jnp.allclose(got2, want2, atol=1e-5, rtol=1e-5):
        ok = False
        print("value mismatch for ragged avg_two")

    if ok:
        print("KERNEL_OK")
</pallas_src>

<mosaic_0001>
module attributes {stable_mosaic.version = 11 : i64} {
  func.func @_cls_kernel(%arg0: i32, %arg1: memref<2x8x32xf32, #tpu.memory_space<vmem>>, %arg2: memref<2x32xf32, #tpu.memory_space<vmem>>) attributes {dimension_semantics = [#tpu.dimension_semantics<parallel>], iteration_bounds = array<i64: 1>, scalar_prefetch = 0 : i64, scratch_operands = 0 : i64, tpu.core_type = #tpu.core_type<tc>, window_params = [{transform_indices = @transform_0, window_bounds = array<i64: 2, 8, 32>}, {transform_indices = @transform_1, window_bounds = array<i64: 2, 32>}]} {
    %c0 = arith.constant 0 : index
    %c0_0 = arith.constant 0 : index
    %c0_1 = arith.constant 0 : index
    %0 = vector.load %arg1[%c0, %c0_0, %c0_1] : memref<2x8x32xf32, #tpu.memory_space<vmem>>, vector<2x1x32xf32>
    %1 = vector.shape_cast %0 : vector<2x1x32xf32> to vector<2x32xf32>
    %c0_2 = arith.constant 0 : index
    %c0_3 = arith.constant 0 : index
    %2 = vector.load %arg2[%c0_2, %c0_3] : memref<2x32xf32, #tpu.memory_space<vmem>>, vector<2x32xf32>
    tpu.vector_store %arg2[%c0_2, %c0_3], %1 {strides = array<i32>} : memref<2x32xf32, #tpu.memory_space<vmem>>, vector<2x32xf32>,
    return
  }
  func.func @transform_0(%arg0: i32) -> (i32, i32, i32) {
    %c0_i32 = arith.constant 0 : i32
    %c0_i32_0 = arith.constant 0 : i32
    %c0_i32_1 = arith.constant 0 : i32
    return %arg0, %c0_i32, %c0_i32_0 : i32, i32, i32
  }
  func.func @transform_1(%arg0: i32) -> (i32, i32) {
    %c0_i32 = arith.constant 0 : i32
    %c0_i32_0 = arith.constant 0 : i32
    return %arg0, %c0_i32 : i32, i32
  }
}

</mosaic_0001>

<bundles_post_ra>
// kernel: tpu_custom_call.1
= control target key start
LH: loop header
LB: loop body
LE: loop exit
PB: predicated region body
PF: predicated region fallthrough
CT: control target
= control target key end

     0   :  { %6 = vsyncpa [#allocation3], 0  ;;  %s138_s0 = inlined_call_operand.hbm [shape: f32[2,8,32], index: 0, kind: input, shape index: {}]   ;;  %s139_s1 = inlined_call_operand.hbm [shape: f32[2,32], index: 1, kind: output, shape index: {}]  }
   0x1   :  { %7 = vsyncpa [#allocation4], 0  ;;  %s100_s6 = smov [#allocation2]   ;;  %s52_s10 = scalar_lea.hbm %s138_s0, 256 }
   0x2   :  { %s13_s7 = sshll.u32 %s100_s6, 4  ;;  %p53_p0 = scmp.ne.s32.totalorder %s138_s0, %s52_s10  ;;  %s14_s7 = int_to_ptr.vmem [resolvable:$true] %s13_s7 }
   0x3   :  { %p56_p1 = scmp.lt.u32.totalorder %s52_s10, %s138_s0 }
   0x5   :  { %p58_p2 = pnand %p56_p1, %p53_p0 }
   0x7   :  { %61 = shalt.err (!%p58_p2)
}
   0x8   :  { %s62_s15 = scalar_lea.vmem %s14_s7, 256  ;;  %p67_p4 = scmp.lt.s32.totalorder %s14_s7, %s14_s7 }
   0x9   :  { %p63_p3 = scmp.ne.s32.totalorder %s14_s7, %s62_s15  ;;  %p68_p5 = scmp.lt.s32.totalorder %s62_s15, %s62_s15 }
   0xb   :  { %p69_p6 = por %p68_p5, %p67_p4 }
   0xd   :  { %p70_p7 = pnand %p69_p6, %p63_p3 }
   0xf   :  { %73 = shalt.err (!%p70_p7)
}
  0x10   :  { %s101_s16 = smov 128   ;;  %s102_s17 = smov 8  }
  0x11   :  { %19 = dma.hbm_to_vmem [thread:$0]  %s138_s0, 256, %s14_s7, [#allocation3], %s101_s16, %s101_s16, %s102_s17  }
  0x12   :  { %96 = dma.done.wait [#allocation3], 256  }
  0x13   :  { %97 = vsyncadd [#allocation3], 4294967040  ;;  %s103_s20 = smov [#allocation5]   ;;  %v23_v0 = vld [vmem:[#allocation2] sm:$0x1]  ;;  %vm28_vm0 = vcmask 1041409  }
  0x14   :  { %s39_s21 = sshll.u32 %s103_s20, 4  ;;  %v24_v1 = vld [vmem:[#allocation2 + $0x8] sm:$0x1]  ;;  %vm31_vm1 = vcmask 254976   ;;  %s40_s21 = int_to_ptr.vmem [resolvable:$true] %s39_s21 }
  0x15   :  { %v27_v2 = vrot.slane %v24_v1, 7  ;;  %s74_s22 = scalar_lea.vmem %s40_s21, 32  ;;  %p79_p9 = scmp.lt.s32.totalorder %s40_s21, %s40_s21 }
  0x16   :  { %p75_p8 = scmp.ne.s32.totalorder %s40_s21, %s74_s22  ;;  %p80_p10 = scmp.lt.s32.totalorder %s74_s22, %s74_s22 }
  0x17   :  { %v29_v3 = vsel %vm28_vm0, %v27_v2, %v23_v0 }
  0x18   :  { %32 = vst.msk [vmem:[#allocation5] sm:$0x3] %vm31_vm1, %v29_v3  ;;  %p81_p11 = por %p80_p10, %p79_p9 }
  0x1a   :  { %p82_p12 = pnand %p81_p11, %p75_p8 }
  0x1c   :  { %85 = shalt.err (!%p82_p12)
}
  0x1d   :  { %s86_s24 = scalar_lea.hbm %s139_s1, 32 }
  0x1e   :  { %p87_p13 = scmp.ne.s32.totalorder %s139_s1, %s86_s24  ;;  %p90_p0 = scmp.lt.u32.totalorder %s86_s24, %s139_s1 }
  0x20   :  { %p92_p1 = pnand %p90_p0, %p87_p13 }
  0x22   :  { %95 = shalt.err (!%p92_p1)
}
  0x23   :  { %42 = dma.vmem_to_hbm [thread:$0]  %s40_s21, 32, %s139_s1, [#allocation4]  }
  0x24   :  { %98 = dma.done.wait [#allocation4], 32  }
  0x25   :  { %99 = vsyncadd [#allocation4], 4294967264 }
  0x26   :  { %46 = vsyncpa [#allocation3], 1 }
  0x27   :  { %47 = vsyncpa [#allocation4], 1 }

</bundles_post_ra>
